<compile_context>
chip_gen: v5e
topology: v5e:2x2
jax: 0.10.0
libtpu: 0.0.40
codegen_flags: <defaults>
</compile_context>

<pallas_src>
import functools

import jax
import jax.numpy as jnp
from jax.experimental import pallas as pl
from jax.experimental.pallas import tpu as pltpu


def _leaky_relu(x, negative_slope=0.2):
    return jnp.where(x >= 0, x, negative_slope * x)


def discriminator_kernel(zt_ref, w1_ref, b1_ref, w2_ref, b2_ref, w3t_ref, b3_ref, o_ref):
    # zt_ref : (z_dim, TILE_B)   compute dtype (bf16), batch on lanes
    # w1_ref : (H, z_dim)        compute dtype (PyTorch [out, in] layout)
    # w2_ref : (H, H)            compute dtype
    # b1_ref, b2_ref : (H, 1)    f32
    # w3t_ref: (H, 1)            f32 (PyTorch w3 transposed)
    # b3_ref : (1, 1)            f32
    # o_ref  : (1, TILE_B)       f32, lane-dense output block
    zt = zt_ref[...]

    # Layer 1: [H, z_dim] @ [z_dim, TILE_B] on the MXU, f32 accumulation.
    h1 = jnp.dot(w1_ref[...], zt, preferred_element_type=jnp.float32) + b1_ref[...]
    h1 = _leaky_relu(h1)

    # Layer 2: [H, H] @ [H, TILE_B] on the MXU, f32 accumulation.
    h2 = jnp.dot(w2_ref[...], h1.astype(w2_ref.dtype),
                 preferred_element_type=jnp.float32) + b2_ref[...]
    h2 = _leaky_relu(h2)

    # Layer 3 (output width 1): keep it off the MXU — VPU multiply with the
    # lane-broadcast [H, 1] column, then a sublane (XLU) reduction.
    h3 = jnp.sum(h2 * w3t_ref[...], axis=0, keepdims=True) + b3_ref[...]
    h3 = _leaky_relu(h3)

    o_ref[...] = h3.astype(o_ref.dtype)


@functools.partial(jax.jit, static_argnames=("tile_b", "compute_dtype"))
def discriminator_forward(z, params, *, tile_b=512, compute_dtype=jnp.bfloat16):
    """z: [B, z_dim] -> preds: [B, 1] (LeakyReLU'd logits, as in the module)."""
    w1, b1, w2, b2, w3t, b3 = params
    B, z_dim = z.shape
    H = w1.shape[0]
    assert tile_b % 128 == 0, "tile_b must be a multiple of 128 (lane width)"

    num_tiles = pl.cdiv(B, tile_b)
    b_pad = num_tiles * tile_b

    # Batch on lanes: transpose z and zero-pad the batch up to a tile multiple.
    zt = jnp.zeros((z_dim, b_pad), compute_dtype).at[:, :B].set(
        z.T.astype(compute_dtype))
    w1c = w1.astype(compute_dtype)
    w2c = w2.astype(compute_dtype)

    out = pl.pallas_call(
        discriminator_kernel,
        out_shape=jax.ShapeDtypeStruct((1, b_pad), jnp.float32),
        grid=(num_tiles,),
        in_specs=[
            pl.BlockSpec((z_dim, tile_b), lambda i: (0, i)),   # z^T tile, pipelined
            pl.BlockSpec((H, z_dim), lambda i: (0, 0)),        # weights stay resident
            pl.BlockSpec((H, 1), lambda i: (0, 0)),
            pl.BlockSpec((H, H), lambda i: (0, 0)),
            pl.BlockSpec((H, 1), lambda i: (0, 0)),
            pl.BlockSpec((H, 1), lambda i: (0, 0)),
            pl.BlockSpec((1, 1), lambda i: (0, 0)),
        ],
        out_specs=pl.BlockSpec((1, tile_b), lambda i: (0, i)),  # lane-dense output
        compiler_params=pltpu.CompilerParams(
            dimension_semantics=("parallel",),  # shard batch tiles across TCs (v7x)
        ),
    )(zt, w1c, b1, w2c, b2, w3t, b3)

    return out[0, :B].reshape(B, 1)


def init_params(key, z_dim=8, n_hidden=64):
    """PyTorch-style uniform(+-1/sqrt(fan_in)) init, stored in kernel layout:
       w1: [H, z_dim], w2: [H, H] (PyTorch [out, in]); w3t: [H, 1] (= w3.T);
       biases as column vectors [H, 1] / [1, 1]."""
    ks = jax.random.split(key, 6)

    def lin(kw, kb, fan_in, fan_out):
        bound = 1.0 / jnp.sqrt(fan_in)
        w = jax.random.uniform(kw, (fan_out, fan_in), jnp.float32, -bound, bound)
        b = jax.random.uniform(kb, (fan_out, 1), jnp.float32, -bound, bound)
        return w, b

    w1, b1 = lin(ks[0], ks[1], z_dim, n_hidden)
    w2, b2 = lin(ks[2], ks[3], n_hidden, n_hidden)
    w3, b3 = lin(ks[4], ks[5], n_hidden, 1)
    return (w1, b1, w2, b2, w3.T, b3)  # store w3 transposed as [H, 1]


def reference_matched(z, params, compute_dtype):
    """Plain-JAX reference with the same bf16-operand / f32-accum math."""
    w1, b1, w2, b2, w3t, b3 = params
    zt = z.T.astype(compute_dtype)
    h1 = _leaky_relu(jnp.dot(w1.astype(compute_dtype), zt,
                             preferred_element_type=jnp.float32) + b1)
    h2 = _leaky_relu(jnp.dot(w2.astype(compute_dtype), h1.astype(compute_dtype),
                             preferred_element_type=jnp.float32) + b2)
    h3 = _leaky_relu(jnp.sum(h2 * w3t, axis=0, keepdims=True) + b3)
    return h3.T


def reference_f32(z, params):
    """Full-f32 reference matching the PyTorch module exactly."""
    w1, b1, w2, b2, w3t, b3 = params
    h = _leaky_relu(z @ w1.T + b1.T)
    h = _leaky_relu(h @ w2.T + b2.T)
    return _leaky_relu(h @ w3t + b3.T)


if __name__ == "__main__":
    key = jax.random.PRNGKey(0)
    k_z, k_p = jax.random.split(key)

    Z_DIM, N_HIDDEN = 8, 64
    params = init_params(k_p, z_dim=Z_DIM, n_hidden=N_HIDDEN)

    # Small batch (padding path) and a multi-tile, non-multiple batch.
    for B in (2, 260):
        kz = jax.random.fold_in(k_z, B)
        z = jax.random.normal(kz, (B, Z_DIM), jnp.float32)

        preds = discriminator_forward(z, params, tile_b=128)
        jax.block_until_ready(preds)
        assert preds.shape == (B, 1)

        # Tight check against a matched-precision (bf16 matmul, f32 accum) reference.
        ref_m = reference_matched(z, params, jnp.bfloat16)
        assert jnp.allclose(preds, ref_m, atol=1e-4, rtol=1e-4)

        # Loose sanity check against the exact-f32 PyTorch-equivalent reference.
        ref_f = reference_f32(z, params)
        assert jnp.allclose(preds, ref_f, atol=1e-1, rtol=1e-1)

    print("KERNEL_OK")
</pallas_src>

<mosaic_0001>
module attributes {stable_mosaic.version = 11 : i64} {
  func.func @discriminator_kernel(%arg0: i32, %arg1: memref<8x128xbf16, #tpu.memory_space<vmem>>, %arg2: memref<64x8xbf16, #tpu.memory_space<vmem>>, %arg3: memref<64x1xf32, #tpu.memory_space<vmem>>, %arg4: memref<64x64xbf16, #tpu.memory_space<vmem>>, %arg5: memref<64x1xf32, #tpu.memory_space<vmem>>, %arg6: memref<64x1xf32, #tpu.memory_space<vmem>>, %arg7: memref<1x1xf32, #tpu.memory_space<vmem>>, %arg8: memref<1x128xf32, #tpu.memory_space<vmem>>) attributes {dimension_semantics = [#tpu.dimension_semantics<parallel>], iteration_bounds = array<i64: 1>, scalar_prefetch = 0 : i64, scratch_operands = 0 : i64, tpu.core_type = #tpu.core_type<tc>, window_params = [{transform_indices = @transform_0, window_bounds = array<i64: 8, 128>}, {pipeline_mode = #tpu.pipeline_mode<synchronous>, transform_indices = @transform_1, window_bounds = array<i64: 64, 8>}, {pipeline_mode = #tpu.pipeline_mode<synchronous>, transform_indices = @transform_2, window_bounds = array<i64: 64, 1>}, {pipeline_mode = #tpu.pipeline_mode<synchronous>, transform_indices = @transform_3, window_bounds = array<i64: 64, 64>}, {pipeline_mode = #tpu.pipeline_mode<synchronous>, transform_indices = @transform_4, window_bounds = array<i64: 64, 1>}, {pipeline_mode = #tpu.pipeline_mode<synchronous>, transform_indices = @transform_5, window_bounds = array<i64: 64, 1>}, {pipeline_mode = #tpu.pipeline_mode<synchronous>, transform_indices = @transform_6, window_bounds = array<i64: 1, 1>}, {transform_indices = @transform_7, window_bounds = array<i64: 1, 128>}]} {
    %c0 = arith.constant 0 : index
    %c0_0 = arith.constant 0 : index
    %0 = vector.load %arg1[%c0, %c0_0] : memref<8x128xbf16, #tpu.memory_space<vmem>>, vector<8x128xbf16>
    %c0_1 = arith.constant 0 : index
    %c0_2 = arith.constant 0 : index
    %1 = vector.load %arg2[%c0_1, %c0_2] : memref<64x8xbf16, #tpu.memory_space<vmem>>, vector<64x8xbf16>
    %cst = arith.constant dense<0.000000e+00> : vector<64x128xf32>
    %2 = tpu.matmul %1, %0, %cst {dimension_numbers = #tpu.dot_dimension_numbers<[1], [0], [0], [1], [0, 0, 1, 1], [], []>} : vector<64x8xbf16>, vector<8x128xbf16>, vector<64x128xf32> -> vector<64x128xf32>
    %c0_3 = arith.constant 0 : index
    %c0_4 = arith.constant 0 : index
    %3 = vector.load %arg3[%c0_3, %c0_4] : memref<64x1xf32, #tpu.memory_space<vmem>>, vector<64x1xf32>
    %4 = vector.broadcast %3 : vector<64x1xf32> to vector<64x128xf32>
    %5 = arith.addf %2, %4 : vector<64x128xf32>
    %cst_5 = arith.constant 0.000000e+00 : f32
    %6 = vector.broadcast %cst_5 : f32 to vector<64x128xf32>
    %7 = arith.cmpf oge, %5, %6 : vector<64x128xf32>
    %cst_6 = arith.constant 2.000000e-01 : f32
    %8 = vector.broadcast %cst_6 : f32 to vector<64x128xf32>
    %9 = arith.mulf %8, %5 : vector<64x128xf32>
    %10 = arith.select %7, %5, %9 : vector<64x128xi1>, vector<64x128xf32>
    %c0_7 = arith.constant 0 : index
    %c0_8 = arith.constant 0 : index
    %11 = vector.load %arg4[%c0_7, %c0_8] : memref<64x64xbf16, #tpu.memory_space<vmem>>, vector<64x64xbf16>
    %12 = arith.truncf %10 : vector<64x128xf32> to vector<64x128xbf16>
    %cst_9 = arith.constant dense<0.000000e+00> : vector<64x128xf32>
    %13 = tpu.matmul %11, %12, %cst_9 {dimension_numbers = #tpu.dot_dimension_numbers<[1], [0], [0], [1], [0, 0, 1, 1], [], []>} : vector<64x64xbf16>, vector<64x128xbf16>, vector<64x128xf32> -> vector<64x128xf32>
    %c0_10 = arith.constant 0 : index
    %c0_11 = arith.constant 0 : index
    %14 = vector.load %arg5[%c0_10, %c0_11] : memref<64x1xf32, #tpu.memory_space<vmem>>, vector<64x1xf32>
    %15 = vector.broadcast %14 : vector<64x1xf32> to vector<64x128xf32>
    %16 = arith.addf %13, %15 : vector<64x128xf32>
    %cst_12 = arith.constant 0.000000e+00 : f32
    %17 = vector.broadcast %cst_12 : f32 to vector<64x128xf32>
    %18 = arith.cmpf oge, %16, %17 : vector<64x128xf32>
    %cst_13 = arith.constant 2.000000e-01 : f32
    %19 = vector.broadcast %cst_13 : f32 to vector<64x128xf32>
    %20 = arith.mulf %19, %16 : vector<64x128xf32>
    %21 = arith.select %18, %16, %20 : vector<64x128xi1>, vector<64x128xf32>
    %c0_14 = arith.constant 0 : index
    %c0_15 = arith.constant 0 : index
    %22 = vector.load %arg6[%c0_14, %c0_15] : memref<64x1xf32, #tpu.memory_space<vmem>>, vector<64x1xf32>
    %23 = vector.broadcast %22 : vector<64x1xf32> to vector<64x128xf32>
    %24 = arith.mulf %21, %23 : vector<64x128xf32>
    %cst_16 = arith.constant dense<0.000000e+00> : vector<128xf32>
    %25 = vector.multi_reduction <add>, %24, %cst_16 [0] : vector<64x128xf32> to vector<128xf32>
    %26 = vector.shape_cast %25 : vector<128xf32> to vector<1x128xf32>
    %c0_17 = arith.constant 0 : index
    %c0_18 = arith.constant 0 : index
    %27 = vector.load %arg7[%c0_17, %c0_18] : memref<1x1xf32, #tpu.memory_space<vmem>>, vector<1x1xf32>
    %28 = vector.broadcast %27 : vector<1x1xf32> to vector<1x128xf32>
    %29 = arith.addf %26, %28 : vector<1x128xf32>
    %cst_19 = arith.constant 0.000000e+00 : f32
    %30 = vector.broadcast %cst_19 : f32 to vector<1x128xf32>
    %31 = arith.cmpf oge, %29, %30 : vector<1x128xf32>
    %cst_20 = arith.constant 2.000000e-01 : f32
    %32 = vector.broadcast %cst_20 : f32 to vector<1x128xf32>
    %33 = arith.mulf %32, %29 : vector<1x128xf32>
    %34 = arith.select %31, %29, %33 : vector<1x128xi1>, vector<1x128xf32>
    %c0_21 = arith.constant 0 : index
    %c0_22 = arith.constant 0 : index
    %35 = vector.load %arg8[%c0_21, %c0_22] : memref<1x128xf32, #tpu.memory_space<vmem>>, vector<1x128xf32>
    tpu.vector_store %arg8[%c0_21, %c0_22], %34 {strides = array<i32>} : memref<1x128xf32, #tpu.memory_space<vmem>>, vector<1x128xf32>,
    return
  }
  func.func @transform_0(%arg0: i32) -> (i32, i32) {
    %c0_i32 = arith.constant 0 : i32
    %c0_i32_0 = arith.constant 0 : i32
    return %c0_i32, %arg0 : i32, i32
  }
  func.func @transform_1(%arg0: i32) -> (i32, i32) {
    %c0_i32 = arith.constant 0 : i32
    %c0_i32_0 = arith.constant 0 : i32
    %c0_i32_1 = arith.constant 0 : i32
    return %c0_i32, %c0_i32_0 : i32, i32
  }
  func.func @transform_2(%arg0: i32) -> (i32, i32) {
    %c0_i32 = arith.constant 0 : i32
    %c0_i32_0 = arith.constant 0 : i32
    %c0_i32_1 = arith.constant 0 : i32
    return %c0_i32, %c0_i32_0 : i32, i32
  }
  func.func @transform_3(%arg0: i32) -> (i32, i32) {
    %c0_i32 = arith.constant 0 : i32
    %c0_i32_0 = arith.constant 0 : i32
    %c0_i32_1 = arith.constant 0 : i32
    return %c0_i32, %c0_i32_0 : i32, i32
  }
  func.func @transform_4(%arg0: i32) -> (i32, i32) {
    %c0_i32 = arith.constant 0 : i32
    %c0_i32_0 = arith.constant 0 : i32
    %c0_i32_1 = arith.constant 0 : i32
    return %c0_i32, %c0_i32_0 : i32, i32
  }
  func.func @transform_5(%arg0: i32) -> (i32, i32) {
    %c0_i32 = arith.constant 0 : i32
    %c0_i32_0 = arith.constant 0 : i32
    %c0_i32_1 = arith.constant 0 : i32
    return %c0_i32, %c0_i32_0 : i32, i32
  }
  func.func @transform_6(%arg0: i32) -> (i32, i32) {
    %c0_i32 = arith.constant 0 : i32
    %c0_i32_0 = arith.constant 0 : i32
    %c0_i32_1 = arith.constant 0 : i32
    return %c0_i32, %c0_i32_0 : i32, i32
  }
  func.func @transform_7(%arg0: i32) -> (i32, i32) {
    %c0_i32 = arith.constant 0 : i32
    %c0_i32_0 = arith.constant 0 : i32
    return %c0_i32, %arg0 : i32, i32
  }
}

</mosaic_0001>

<bundles_post_ra>
// kernel: discriminator_forward.1
= control target key start
LH: loop header
LB: loop body
LE: loop exit
PB: predicated region body
PF: predicated region fallthrough
CT: control target
= control target key end

     0   :  { %vm119_vm0 = vcmask 1043456   ;;  %v464_v0 = vmov 0   ;;  %vm106_vm1 = vcmask 64512   ;;  %vm256_vm10 = vcmask 523264   ;;  %s614_s2 = inlined_call_operand.vmem [shape: f32[64,1], index: 2, kind: input, shape index: {}]   ;;  %s615_s0 = inlined_call_operand.vmem [shape: bf16[8,128], index: 0, kind: input, shape index: {}]   ;;  %s616_s1 = inlined_call_operand.vmem [shape: bf16[64,8], index: 1, kind: input, shape index: {}]   ;;  %s617_s4 = inlined_call_operand.vmem [shape: f32[64,1], index: 4, kind: input, shape index: {}]   ;;  %s618_s6 = inlined_call_operand.<no memory space> [shape: f32[1,1], index: 6, kind: input, shape index: {}]   ;;  %s619_s5 = inlined_call_operand.vmem [shape: f32[64,1], index: 5, kind: input, shape index: {}]   ;;  %s620_s3 = inlined_call_operand.vmem [shape: bf16[64,64], index: 3, kind: input, shape index: {}]   ;;  %s621_s7 = inlined_call_operand.vmem [shape: f32[1,128], index: 7, kind: output, shape index: {}]  }
   0x1   :  { %461 = vset.pattern.permute.xlu0 %v464_v0  ;;  %462 = vset.pattern.permute.xlu1 %v464_v0  ;;  %v44_v1 = vld [vmem:[%s614_s2 + $0x30] sm:$0xff]  ;;  %v42_v2 = vld [vmem:[%s614_s2 + $0x20] sm:$0xff]  ;;  %v448_v5 = vld [vmem:[%s616_s1 + $0x8] sm:$0xff]  ;;  %v12_v17 = vstv %s618_s6 }
   0x2   :  { %v29_v3 = vld [vmem:[%s615_s0] sm:$0xf]  ;;  %78 = vperm.xlu0 %461, %v44_v1   ;;  %68 = vperm.xlu1 %462, %v42_v2   ;;  %v40_v6 = vld [vmem:[%s614_s2 + $0x10] sm:$0xff]  ;;  %v45_v8 = vld [vmem:[%s614_s2 + $0x38] sm:$0xff]  ;;  %13 = vst [vmem:[#allocation2] sm:$0x1] %v12_v17 }
   0x3   :  { %v121_v4 = vsel %vm119_vm0, %v29_v3, 0  ;;  %463 = vset.pattern.permute.xlu2 %v464_v0  ;;  %v447_v7 = vld [vmem:[%s616_s1] sm:$0xff]  ;;  %v43_v9 = vld [vmem:[%s614_s2 + $0x28] sm:$0xff]  ;;  %v41_v10 = vld [vmem:[%s614_s2 + $0x18] sm:$0xff] }
   0x4   :  { %455 = vmatpush.bf16.msra.mxu3 %v121_v4  ;;  %130 = vmatpush.bf16.msra.mxu0 %v121_v4  ;;  %v38_v11 = vld [vmem:[%s614_s2] sm:$0xff]  ;;  %v39_v12 = vld [vmem:[%s614_s2 + $0x8] sm:$0xff]  ;;  %v449_v13 = vld [vmem:[%s616_s1 + $0x10] sm:$0xff] }
   0x5   :  { %58 = vperm.xlu2 %463, %v40_v6   ;;  %v188_v14 = vld [vmem:[%s617_s4] sm:$0xff]  ;;  %v189_v15 = vld [vmem:[%s617_s4 + $0x8] sm:$0xff]  ;;  %v190_v16 = vld [vmem:[%s617_s4 + $0x10] sm:$0xff] }
   0x6   :  { %v191_v18 = vld [vmem:[%s617_s4 + $0x18] sm:$0xff]  ;;  %v192_v19 = vld [vmem:[%s617_s4 + $0x20] sm:$0xff]  ;;  %v323_v22 = vld [vmem:[%s619_s5 + $0x8] sm:$0xff] }
   0x7   :  { %424 = vmatmul.msk.bf16.vlgmr.msra.gmra.mxu3 %vm106_vm1, %v448_v5  ;;  %423 = vmatmul.msk.bf16.vlgmr.msra.gmra.mxu0 %vm106_vm1, %v447_v7  ;;  %v322_v20 = vld [vmem:[%s619_s5] sm:$0xff]  ;;  %v450_v21 = vld [vmem:[%s616_s1 + $0x18] sm:$0xff]  ;;  %v324_v23 = vld [vmem:[%s619_s5 + $0x10] sm:$0xff] }
   0x8   :  { %v193_v24 = vld [vmem:[%s617_s4 + $0x28] sm:$0xff]  ;;  %v325_v25 = vld [vmem:[%s619_s5 + $0x18] sm:$0xff]  ;;  %v194_v26 = vld [vmem:[%s617_s4 + $0x30] sm:$0xff] }
   0x9   :  { %v326_v27 = vld [vmem:[%s619_s5 + $0x20] sm:$0xff]  ;;  %v195_v28 = vld [vmem:[%s617_s4 + $0x38] sm:$0xff]  ;;  %v327_v29 = vld [vmem:[%s619_s5 + $0x28] sm:$0xff] }
   0xa   :  { %83 = vperm.xlu0 %461, %v45_v8   ;;  %73 = vperm.xlu1 %462, %v43_v9   ;;  %v328_v30 = vld [vmem:[%s619_s5 + $0x30] sm:$0xff]  ;;  %v329_v31 = vld [vmem:[%s619_s5 + $0x38] sm:$0xff]  ;;  %v391_v32 = vld [vmem:[#allocation2] sm:$0x1] }
   0xd   :  { %63 = vperm.xlu2 %463, %v41_v10  }
  0x12   :  { %48 = vperm.xlu0 %461, %v38_v11   ;;  %53 = vperm.xlu1 %462, %v39_v12  }
  0x15   :  { %198 = vperm.xlu2 %463, %v188_v14   ;;  %v453_v14 = vld [vmem:[%s620_s3 + $0x10] sm:$0xff] }
  0x17   :  { %425 = vmatmul.msk.bf16.gmra.mxu3 %vm106_vm1, %v449_v13  ;;  %v451_v13 = vld [vmem:[%s620_s3] sm:$0xff] }
  0x1a   :  { %203 = vperm.xlu0 %461, %v189_v15   ;;  %208 = vperm.xlu1 %462, %v190_v16   ;;  %v452_v15 = vld [vmem:[%s620_s3 + $0x8] sm:$0xff]  ;;  %v454_v16 = vld [vmem:[%s620_s3 + $0x18] sm:$0xff] }
  0x1d   :  { %213 = vperm.xlu2 %463, %v191_v18  }
  0x22   :  { %218 = vperm.xlu0 %461, %v192_v19   ;;  %332 = vperm.xlu1 %462, %v322_v20  }
  0x25   :  { %337 = vperm.xlu2 %463, %v323_v22  }
  0x27   :  { %426 = vmatmul.msk.bf16.gmra.mxu3 %vm106_vm1, %v450_v21 }
  0x2a   :  { %342 = vperm.xlu0 %461, %v324_v23   ;;  %223 = vperm.xlu1 %462, %v193_v24  }
  0x2d   :  { %347 = vperm.xlu2 %463, %v325_v25  }
  0x32   :  { %228 = vperm.xlu0 %461, %v194_v26   ;;  %352 = vperm.xlu1 %462, %v326_v27  }
  0x35   :  { %233 = vperm.xlu2 %463, %v195_v28  }
  0x3a   :  { %357 = vperm.xlu0 %461, %v327_v29   ;;  %362 = vperm.xlu1 %462, %v328_v30  }
  0x3d   :  { %367 = vperm.xlu2 %463, %v329_v31  }
  0x42   :  { %394 = vperm.xlu0 %461, %v391_v32  }
  0x5f   :  { %v59_v39 = vpop.permute.xlu2 %58 }
  0x67   :  { %v64_v50 = vpop.permute.xlu2 %63 }
  0x6f   :  { %v199_v17 = vpop.permute.xlu2 %198 }
  0x74   :  { %v79_v37 = vpop.permute.xlu0 %78  ;;  %v69_v38 = vpop.permute.xlu1 %68 }
  0x77   :  { %v214_v20 = vpop.permute.xlu2 %213 }
  0x7c   :  { %v84_v42 = vpop.permute.xlu0 %83  ;;  %v74_v43 = vpop.permute.xlu1 %73 }
  0x7f   :  { %v338_v25 = vpop.permute.xlu2 %337 }
  0x84   :  { %v132_v41 = vpop.f32.mrf.mxu0  ;;  %v49_v59 = vpop.permute.xlu0 %48 }
  0x85   :  { %v54_v60 = vpop.permute.xlu1 %53  ;;  %v133_v63 = vadd.f32 %v132_v41, %v49_v59 }
  0x87   :  { %v160_v5 = vmul.f32 0.2, %v133_v63  ;;  %vm152_vm8 = vcmp.ge.f32.partialorder %v133_v63, 0.0 }
  0x89   :  { %v168_v10 = vsel %vm152_vm8, %v133_v63, %v160_v5 }
  0x8a   :  { %v137_v33 = vpop.f32.mrf.mxu3 }
  0x8b   :  { %v138_v55 = vadd.f32 %v137_v33, %v59_v39  ;;  %v348_v33 = vpop.permute.xlu2 %347 }
  0x8c   :  { %v134_v54 = vpop.f32.mrf.mxu0  ;;  %v204_v18 = vpop.permute.xlu0 %203 }
  0x8d   :  { %v135_v0 = vadd.f32 %v134_v54, %v54_v60  ;;  %v162_v2 = vmul.f32 0.2, %v138_v55  ;;  %vm154_vm7 = vcmp.ge.f32.partialorder %v138_v55, 0.0  ;;  %v209_v19 = vpop.permute.xlu1 %208 }
  0x8f   :  { %v161_v6 = vmul.f32 0.2, %v135_v0  ;;  %vm153_vm9 = vcmp.ge.f32.partialorder %v135_v0, 0.0  ;;  %v170_v8 = vsel %vm154_vm7, %v138_v55, %v162_v2 }
  0x91   :  { %v169_v11 = vsel %vm153_vm9, %v135_v0, %v161_v6 }
  0x92   :  { %v139_v34 = vpop.f32.mrf.mxu3  ;;  %v184_v12 = vpack.c.bf16 %v169_v11, %v168_v10 }
  0x93   :  { %v140_v51 = vadd.f32 %v139_v34, %v64_v50 }
  0x94   :  { %v219_v22 = vpop.permute.xlu0 %218 }
  0x95   :  { %v163_v62 = vmul.f32 0.2, %v140_v51  ;;  %vm155_vm6 = vcmp.ge.f32.partialorder %v140_v51, 0.0  ;;  %v333_v23 = vpop.permute.xlu1 %332 }
  0x97   :  { %v171_v7 = vsel %vm155_vm6, %v140_v51, %v163_v62 }
  0x98   :  { %v185_v9 = vpack.c.bf16 %v171_v7, %v170_v8 }
  0x9a   :  { %v142_v35 = vpop.f32.mrf.mxu3 }
  0x9b   :  { %v143_v47 = vadd.f32 %v142_v35, %v69_v38 }
  0x9c   :  { %v343_v27 = vpop.permute.xlu0 %342 }
  0x9d   :  { %v164_v56 = vmul.f32 0.2, %v143_v47  ;;  %vm156_vm5 = vcmp.ge.f32.partialorder %v143_v47, 0.0  ;;  %v224_v30 = vpop.permute.xlu1 %223 }
  0x9f   :  { %v172_v3 = vsel %vm156_vm5, %v143_v47, %v164_v56 }
  0xa2   :  { %v144_v36 = vpop.f32.mrf.mxu3 }
  0xa3   :  { %v145_v45 = vadd.f32 %v144_v36, %v74_v43 }
  0xa4   :  { %v229_v41 = vpop.permute.xlu0 %228 }
  0xa5   :  { %v165_v52 = vmul.f32 0.2, %v145_v45  ;;  %vm157_vm4 = vcmp.ge.f32.partialorder %v145_v45, 0.0  ;;  %v353_v47 = vpop.permute.xlu1 %352 }
  0xa7   :  { %v173_v1 = vsel %vm157_vm4, %v145_v45, %v165_v52 }
  0xa8   :  { %v186_v4 = vpack.c.bf16 %v173_v1, %v172_v3 }
  0xaa   :  { %v147_v40 = vpop.f32.mrf.mxu3 }
  0xab   :  { %v148_v44 = vadd.f32 %v147_v40, %v79_v37 }
  0xac   :  { %v358_v3 = vpop.permute.xlu0 %357 }
  0xad   :  { %v166_v48 = vmul.f32 0.2, %v148_v44  ;;  %vm158_vm2 = vcmp.ge.f32.partialorder %v148_v44, 0.0  ;;  %v363_v8 = vpop.permute.xlu1 %362 }
  0xaf   :  { %v174_v57 = vsel %vm158_vm2, %v148_v44, %v166_v48 }
  0xb2   :  { %v149_v46 = vpop.f32.mrf.mxu3 }
  0xb3   :  { %v150_v49 = vadd.f32 %v149_v46, %v84_v42 }
  0xb5   :  { %v167_v53 = vmul.f32 0.2, %v150_v49  ;;  %vm159_vm3 = vcmp.ge.f32.partialorder %v150_v49, 0.0 }
  0xb7   :  { %v175_v58 = vsel %vm159_vm3, %v150_v49, %v167_v53  ;;  %v234_v53 = vpop.permute.xlu2 %233 }
  0xb8   :  { %v187_v61 = vpack.c.bf16 %v175_v58, %v174_v57 }
  0xba   :  { %273 = vmatpush.bf16.msra.mxu1 %v187_v61  ;;  %456 = vmatpush.bf16.msra.mxu2 %v187_v61 }
  0xbe   :  { %274 = vmatpush.bf16.msra.mxu1 %v186_v4  ;;  %457 = vmatpush.bf16.msra.mxu2 %v186_v4 }
  0xc2   :  { %275 = vmatpush.bf16.msra.mxu1 %v185_v9  ;;  %458 = vmatpush.bf16.msra.mxu2 %v185_v9 }
  0xc6   :  { %276 = vmatpush.bf16.msra.mxu1 %v184_v12  ;;  %459 = vmatpush.bf16.msra.mxu2 %v184_v12  ;;  %v368_v12 = vpop.permute.xlu2 %367 }
  0xc9   :  { %443 = vmatmul.msk.bf16.vlgmr.msra.gmra.mxu1 %vm256_vm10, %v451_v13  ;;  %445 = vmatmul.msk.bf16.vlgmr.msra.gmra.mxu2 %vm256_vm10, %v453_v14 }
  0xd9   :  { %444 = vmatmul.msk.bf16.gmra.mxu1 %vm256_vm10, %v452_v15  ;;  %446 = vmatmul.msk.bf16.gmra.mxu2 %vm256_vm10, %v454_v16 }
 0x146   :  { %v278_v21 = vpop.f32.mrf.mxu1 }
 0x147   :  { %v279_v31 = vadd.f32 %v278_v21, %v199_v17 }
 0x149   :  { %v306_v36 = vmul.f32 0.2, %v279_v31  ;;  %vm298_vm12 = vcmp.ge.f32.partialorder %v279_v31, 0.0 }
 0x14b   :  { %v314_v42 = vsel %vm298_vm12, %v279_v31, %v306_v36 }
 0x14c   :  { %v288_v24 = vpop.f32.mrf.mxu2  ;;  %v370_v51 = vmul.f32 %v333_v23, %v314_v42 }
 0x14d   :  { %v289_v38 = vadd.f32 %v288_v24, %v219_v22 }
 0x14e   :  { %v280_v26 = vpop.f32.mrf.mxu1 }
 0x14f   :  { %v281_v28 = vadd.f32 %v280_v26, %v204_v18  ;;  %v310_v48 = vmul.f32 0.2, %v289_v38  ;;  %vm302_vm14 = vcmp.ge.f32.partialorder %v289_v38, 0.0 }
 0x151   :  { %v307_v34 = vmul.f32 0.2, %v281_v28  ;;  %vm299_vm11 = vcmp.ge.f32.partialorder %v281_v28, 0.0  ;;  %v318_v57 = vsel %vm302_vm14, %v289_v38, %v310_v48 }
 0x152   :  { %v374_v1 = vmul.f32 %v353_v47, %v318_v57 }
 0x153   :  { %v315_v39 = vsel %vm299_vm11, %v281_v28, %v307_v34 }
 0x154   :  { %v290_v29 = vpop.f32.mrf.mxu2  ;;  %v371_v45 = vmul.f32 %v338_v25, %v315_v39 }
 0x155   :  { %v291_v43 = vadd.f32 %v290_v29, %v224_v30 }
 0x156   :  { %v283_v32 = vpop.f32.mrf.mxu1  ;;  %v378_v56 = vadd.f32 %v371_v45, %v370_v51 }
 0x157   :  { %v284_v35 = vadd.f32 %v283_v32, %v209_v19  ;;  %v311_v54 = vmul.f32 0.2, %v291_v43  ;;  %vm303_vm0 = vcmp.ge.f32.partialorder %v291_v43, 0.0 }
 0x159   :  { %v308_v37 = vmul.f32 0.2, %v284_v35  ;;  %vm300_vm13 = vcmp.ge.f32.partialorder %v284_v35, 0.0  ;;  %v319_v63 = vsel %vm303_vm0, %v291_v43, %v311_v54 }
 0x15a   :  { %v375_v6 = vmul.f32 %v358_v3, %v319_v63 }
 0x15b   :  { %v316_v44 = vsel %vm300_vm13, %v284_v35, %v308_v37 }
 0x15c   :  { %v293_v40 = vpop.f32.mrf.mxu2  ;;  %v372_v52 = vmul.f32 %v343_v27, %v316_v44 }
 0x15d   :  { %v294_v49 = vadd.f32 %v293_v40, %v229_v41 }
 0x15e   :  { %v285_v46 = vpop.f32.mrf.mxu1  ;;  %v379_v60 = vadd.f32 %v378_v56, %v372_v52 }
 0x15f   :  { %v286_v50 = vadd.f32 %v285_v46, %v214_v20  ;;  %v312_v58 = vmul.f32 0.2, %v294_v49  ;;  %vm304_vm1 = vcmp.ge.f32.partialorder %v294_v49, 0.0  ;;  %v395_v20 = vpop.permute.xlu0 %394 }
 0x160   :  { %v397_v22 = vperm.slane %v395_v20, 0 }
 0x161   :  { %vm301_vm15 = vcmp.ge.f32.partialorder %v286_v50, 0.0  ;;  %v309_v55 = vmul.f32 0.2, %v286_v50  ;;  %v320_v4 = vsel %vm304_vm1, %v294_v49, %v312_v58 }
 0x162   :  { %v376_v10 = vmul.f32 %v363_v8, %v320_v4 }
 0x163   :  { %v317_v59 = vsel %vm301_vm15, %v286_v50, %v309_v55 }
 0x164   :  { %v373_v61 = vmul.f32 %v348_v33, %v317_v59  ;;  %v295_v62 = vpop.f32.mrf.mxu2 }
 0x165   :  { %v296_v0 = vadd.f32 %v295_v62, %v234_v53 }
 0x166   :  { %v380_v2 = vadd.f32 %v379_v60, %v373_v61 }
 0x167   :  { %vm305_vm2 = vcmp.ge.f32.partialorder %v296_v0, 0.0  ;;  %v313_v5 = vmul.f32 0.2, %v296_v0 }
 0x168   :  { %v381_v7 = vadd.f32 %v380_v2, %v374_v1 }
 0x169   :  { %v321_v9 = vsel %vm305_vm2, %v296_v0, %v313_v5 }
 0x16a   :  { %v382_v11 = vadd.f32 %v381_v7, %v375_v6  ;;  %v377_v13 = vmul.f32 %v368_v12, %v321_v9 }
 0x16c   :  { %v383_v14 = vadd.f32 %v382_v11, %v376_v10 }
 0x16e   :  { %v384_v15 = vadd.f32 %v383_v14, %v377_v13 }
 0x170   :  { %v385_v16 = vrot.slane %v384_v15, 4 }
 0x172   :  { %v386_v17 = vadd.f32 %v385_v16, %v384_v15 }
 0x174   :  { %v387_v18 = vrot.slane %v386_v17, 2 }
 0x176   :  { %v388_v19 = vadd.f32 %v387_v18, %v386_v17 }
 0x178   :  { %v389_v21 = vrot.slane %v388_v19, 1 }
 0x17a   :  { %v390_v23 = vadd.f32 %v389_v21, %v388_v19 }
 0x17c   :  { %v398_v24 = vadd.f32 %v397_v22, %v390_v23 }
 0x17e   :  { %vm399_vm3 = vcmp.ge.f32.partialorder %v398_v24, 0.0  ;;  %v400_v25 = vmul.f32 0.2, %v398_v24 }
 0x180   :  { %v401_v26 = vsel %vm399_vm3, %v398_v24, %v400_v25 }
 0x181   :  { %402 = vst [vmem:[%s621_s7] sm:$0x1] %v401_v26 }

</bundles_post_ra>
